<compile_context>
chip_gen: v7x
topology: tpu7x:2x2x1
jax: 0.10.0
libtpu: 0.0.40
codegen_flags: <defaults>
</compile_context>

<pallas_src>
import jax
import jax.numpy as jnp
from jax.experimental import pallas as pl
from jax.experimental.pallas import tpu as pltpu


def _mlp_kernel(x_ref, p_ref, o_ref):
    x_row = x_ref[...]          # (1, 4)  input features
    w0    = p_ref[0:2, :]       # (2, 4)  Linear(4,2) weight rows
    b0    = p_ref[2:4, 0:1]     # (2, 1)  Linear(4,2) bias (as a column)
    w1    = p_ref[4:6, 0:1]     # (2, 1)  Linear(2,1) weight (as a column)
    b1    = p_ref[6:7, 0:1]     # (1, 1)  Linear(2,1) bias

    # Layer 0: VPU broadcast-multiply + 4-lane reduction (no MXU, no padding).
    h = jnp.sum(x_row * w0, axis=-1, keepdims=True)        # (2, 1)
    h = jnp.maximum(h + b0, 0.0)                            # ReLU

    # Layer 1: two scalar-sized multiply-adds on the VPU.
    out = h[0:1, :] * w1[0:1, :] + h[1:2, :] * w1[1:2, :] + b1   # (1, 1)

    o_ref[...] = out


def pack_params(params):
    """One-time packing of all parameters into a compact (8,4) f32 tile."""
    w0 = params["w0"].astype(jnp.float32)   # (2, 4)
    b0 = params["b0"].astype(jnp.float32)   # (2,)
    w1 = params["w1"].astype(jnp.float32)   # (1, 2)
    b1 = params["b1"].astype(jnp.float32)   # (1,)
    p = jnp.zeros((8, 4), jnp.float32)
    p = p.at[0:2, :].set(w0)
    p = p.at[2:4, 0].set(b0)
    p = p.at[4:6, 0].set(w1[0, :])
    p = p.at[6, 0].set(b1[0])
    return p


@jax.jit
def _forward_1d(x, packed_params):
    vmem = pl.BlockSpec(memory_space=pltpu.MemorySpace.VMEM)
    out = pl.pallas_call(
        _mlp_kernel,
        out_shape=jax.ShapeDtypeStruct((1, 1), jnp.float32),
        in_specs=[vmem, vmem],
        out_specs=vmem,
    )(x.astype(jnp.float32).reshape(1, 4), packed_params)
    # torch Linear(2,1) on a 1-D input returns shape (1,)
    return out.reshape(1)


def control_flow_module(x, packed_params):
    """Mirrors ControlFlowModule.forward semantics."""
    # `input.dim() > 1` is static on the JAX side -> resolve in Python.
    if x.ndim > 1:
        return jnp.array(0, dtype=jnp.int32)  # torch.tensor(0)
    return _forward_1d(x, packed_params)


def init_params(key):
    """Deterministic init matching the torch module's parameter shapes."""
    k0, k1, k2, k3 = jax.random.split(key, 4)
    # torch.nn.Linear convention: weight (out, in), bias (out,)
    return {
        "w0": jax.random.uniform(k0, (2, 4), jnp.float32, -0.5, 0.5),
        "b0": jax.random.uniform(k1, (2,), jnp.float32, -0.5, 0.5),
        "w1": jax.random.uniform(k2, (1, 2), jnp.float32, -0.5, 0.5),
        "b1": jax.random.uniform(k3, (1,), jnp.float32, -0.5, 0.5),
    }


def _reference(x, params):
    if x.ndim > 1:
        return jnp.array(0, dtype=jnp.int32)
    h = jnp.maximum(x @ params["w0"].T + params["b0"], 0.0)
    return h @ params["w1"].T + params["b1"]


if __name__ == "__main__":
    key = jax.random.PRNGKey(0)
    kp, kx = jax.random.split(key)
    params = init_params(kp)
    packed_params = pack_params(params)  # hoisted out of the hot path

    # 1-D input path (the real compute path): x has 4 features.
    x = jax.random.normal(kx, (4,), jnp.float32)
    out = jax.block_until_ready(control_flow_module(x, packed_params))
    ref = _reference(x, params)
    assert out.shape == (1,), out.shape
    assert jnp.allclose(out, ref, atol=1e-5, rtol=1e-5), (out, ref)

    # >1-D input path: module short-circuits to scalar 0.
    x2 = jax.random.normal(kx, (2, 4), jnp.float32)
    out2 = jax.block_until_ready(control_flow_module(x2, packed_params))
    assert int(out2) == 0

    print("KERNEL_OK")
</pallas_src>

<mosaic_0001>
module attributes {stable_mosaic.version = 11 : i64} {
  func.func @_mlp_kernel(%arg0: memref<1x4xf32, #tpu.memory_space<vmem>>, %arg1: memref<8x4xf32, #tpu.memory_space<vmem>>, %arg2: memref<1x1xf32, #tpu.memory_space<vmem>>) attributes {dimension_semantics = [], scalar_prefetch = 0 : i64, scratch_operands = 0 : i64, tpu.core_type = #tpu.core_type<tc>} {
    %c0 = arith.constant 0 : index
    %c0_0 = arith.constant 0 : index
    %0 = vector.load %arg0[%c0, %c0_0] : memref<1x4xf32, #tpu.memory_space<vmem>>, vector<1x4xf32>
    %c0_1 = arith.constant 0 : index
    %c0_2 = arith.constant 0 : index
    %1 = vector.load %arg1[%c0_1, %c0_2] : memref<8x4xf32, #tpu.memory_space<vmem>>, vector<2x4xf32>
    %c2 = arith.constant 2 : index
    %c0_3 = arith.constant 0 : index
    %2 = vector.load %arg1[%c2, %c0_3] : memref<8x4xf32, #tpu.memory_space<vmem>>, vector<2x1xf32>
    %c4 = arith.constant 4 : index
    %c0_4 = arith.constant 0 : index
    %3 = vector.load %arg1[%c4, %c0_4] : memref<8x4xf32, #tpu.memory_space<vmem>>, vector<2x1xf32>
    %c6 = arith.constant 6 : index
    %c0_5 = arith.constant 0 : index
    %4 = vector.load %arg1[%c6, %c0_5] : memref<8x4xf32, #tpu.memory_space<vmem>>, vector<1x1xf32>
    %5 = vector.broadcast %0 : vector<1x4xf32> to vector<2x4xf32>
    %6 = arith.mulf %5, %1 : vector<2x4xf32>
    %cst = arith.constant dense<0.000000e+00> : vector<2xf32>
    %7 = vector.multi_reduction <add>, %6, %cst [1] : vector<2x4xf32> to vector<2xf32>
    %8 = vector.shape_cast %7 : vector<2xf32> to vector<2x1xf32>
    %9 = arith.addf %8, %2 : vector<2x1xf32>
    %cst_6 = arith.constant 0.000000e+00 : f32
    %10 = vector.broadcast %cst_6 : f32 to vector<2x1xf32>
    %11 = arith.maximumf %9, %10 : vector<2x1xf32>
    %12 = vector.extract_strided_slice %11 {offsets = [0, 0], sizes = [1, 1], strides = [1, 1]} : vector<2x1xf32> to vector<1x1xf32>
    %13 = vector.extract_strided_slice %3 {offsets = [0, 0], sizes = [1, 1], strides = [1, 1]} : vector<2x1xf32> to vector<1x1xf32>
    %14 = arith.mulf %12, %13 : vector<1x1xf32>
    %15 = vector.extract_strided_slice %11 {offsets = [1, 0], sizes = [1, 1], strides = [1, 1]} : vector<2x1xf32> to vector<1x1xf32>
    %16 = vector.extract_strided_slice %3 {offsets = [1, 0], sizes = [1, 1], strides = [1, 1]} : vector<2x1xf32> to vector<1x1xf32>
    %17 = arith.mulf %15, %16 : vector<1x1xf32>
    %18 = arith.addf %14, %17 : vector<1x1xf32>
    %19 = arith.addf %18, %4 : vector<1x1xf32>
    %c0_7 = arith.constant 0 : index
    %c0_8 = arith.constant 0 : index
    %20 = vector.load %arg2[%c0_7, %c0_8] : memref<1x1xf32, #tpu.memory_space<vmem>>, vector<1x1xf32>
    tpu.vector_store %arg2[%c0_7, %c0_8], %19 {strides = array<i32>} : memref<1x1xf32, #tpu.memory_space<vmem>>, vector<1x1xf32>,
    return
  }
}

</mosaic_0001>

<bundles_post_ra>
// kernel: _forward_1d.1
= control target key start
LH: loop header
LB: loop body
LE: loop exit
PB: predicated region body
PF: predicated region fallthrough
CT: control target
= control target key end

     0   :  { %vm24_vm0 = vcmask 25600   ;;  %s121_s0 = inlined_call_operand.vmem [shape: f32[1,4], index: 0, kind: input, shape index: {}]   ;;  %s122_s1 = inlined_call_operand.vmem [shape: f32[8,4], index: 1, kind: input, shape index: {}]   ;;  %s123_s2 = inlined_call_operand.hbm [shape: f32[1,1], index: 2, kind: output, shape index: {}]  }
   0x1   :  { %v52_v0 = vld [vmem:[%s121_s0] ss:$0 sm:$0xff] }
   0x2   :  { %v13_v1 = vld [vmem:[%s122_s1] sm:$0x3] }
   0x3   :  { %v23_v2 = vmul.f32 %v52_v0, %v13_v1 }
   0x4   :  { %7 = vsyncpa [#allocation3], 0  ;;  %v14_v4 = vld [vmem:[%s122_s1 + $0x2] sm:$0x3]  ;;  %v15_v7 = vld [vmem:[%s122_s1 + $0x4] sm:$0x3] }
   0x5   :  { %v25_v3 = vsel %vm24_vm0, %v23_v2, 0.0  ;;  %v16_v11 = vld [vmem:[%s122_s1 + $0x6] sm:$0x1]  ;;  %s78_s18 = smov [#allocation2]   ;;  %vm36_vm1 = vcmask 0  }
   0x6   :  { %26 = vadd.xlane.f32.xlu0 %v25_v3  ;;  %s44_s19 = sshll.u32 %s78_s18, 4  ;;  %s45_s19 = int_to_ptr.vmem [resolvable:$true] %s44_s19 }
   0x7   :  { %s54_s20 = scalar_lea.vmem %s45_s19, 16  ;;  %s58_s21 = scalar_lea.vmem %s45_s19, 32 }
   0x8   :  { %p55_p0 = scmp.ne.s32.totalorder %s45_s19, %s54_s20  ;;  %p59_p1 = scmp.lt.s32.totalorder %s45_s19, %s45_s19 }
   0x9   :  { %p60_p2 = scmp.lt.s32.totalorder %s58_s21, %s54_s20 }
   0xb   :  { %p61_p3 = por %p60_p2, %p59_p1 }
   0xd   :  { %p62_p4 = pnand %p61_p3, %p55_p0 }
  0x93   :  { %v27_v5 = vpop.xlane.xlu0 %26 }
  0x94   :  { %v28_v6 = vadd.f32 %v27_v5, %v14_v4 }
  0x96   :  { %v29_v8 = vmax.f32 %v28_v6, 0.0 }
  0x98   :  { %v30_v9 = vmul.f32 %v29_v8, %v15_v7 }
  0x9a   :  { %v32_v10 = vrot.slane %v30_v9, 1 }
  0x9c   :  { %v34_v12 = vadd.f32 %v32_v10, %v30_v9 }
  0x9e   :  { %v35_v13 = vadd.f32 %v34_v12, %v16_v11 }
  0xa0   :  { %37 = vst.msk [vmem:[#allocation2] sm:$0x1] %vm36_vm1, %v35_v13 }
  0xa1   :  { %65 = shalt.err (!%p62_p4)
}
  0xa2   :  { %s66_s24 = scalar_lea.hbm %s123_s2, 16 }
  0xa3   :  { %p67_p5 = scmp.ne.s32.totalorder %s123_s2, %s66_s24  ;;  %p70_p6 = scmp.lt.u32.totalorder %s66_s24, %s123_s2 }
  0xa5   :  { %p72_p7 = pnand %p70_p6, %p67_p5 }
  0xa7   :  { %75 = shalt.err (!%p72_p7)
}
  0xa8   :  { %47 = dma.vmem_to_hbm [thread:$0]  %s45_s19, 16, %s123_s2, [#allocation3]  }
  0xa9   :  { %76 = dma.done.wait [#allocation3], 16  }
  0xaa   :  { %77 = vsyncadd [#allocation3], 4294967280 }
  0xab   :  { %51 = vsyncpa [#allocation3], 1 }

</bundles_post_ra>
